<compile_context>
chip_gen: v7x
topology: tpu7x:2x2x1
jax: 0.10.0
libtpu: 0.0.40
codegen_flags: <defaults>
</compile_context>

<pallas_src>
import functools
import math

import jax
import jax.numpy as jnp
from jax.experimental import pallas as pl
from jax.experimental.pallas import tpu as pltpu


def _mhsa_kernel(xq_ref, xk_ref, xv_ref,
                 wq_ref, bq_ref, wk_ref, bk_ref, wv_ref, bv_ref,
                 out_ref, *, n_heads, d_k, d_v):
    # Current (batch, q-tile) block.  Activations / weights arrive as bf16
    # for the MXU; biases and all elementwise math are f32.
    xq = xq_ref[0]                       # (TQ, d_model) bf16
    xk = xk_ref[0]                       # (S , d_model) bf16
    xv = xv_ref[0]                       # (S , d_model) bf16

    scale = 1.0 / math.sqrt(d_k)

    # --- QKV projections: wide single GEMMs (full MXU lane width), f32 acc.
    # (If Q/K/V were the same tensor, W_Q|W_K|W_V could be fused into one
    #  even wider GEMM; inputs here are distinct, so keep three.)
    q = jnp.dot(xq, wq_ref[...], preferred_element_type=jnp.float32) + bq_ref[...]
    k = jnp.dot(xk, wk_ref[...], preferred_element_type=jnp.float32) + bk_ref[...]
    v = jnp.dot(xv, wv_ref[...], preferred_element_type=jnp.float32) + bv_ref[...]
    # Fold the softmax scale into q once: O(TQ*H*d_k) muls instead of
    # O(H*TQ*S) on the scores.
    q = q * scale

    # --- Split heads into a head-major batch dim: (T, H*d) -> (H, T, d).
    # Cheap lane-slice + stack relayout; the expensive work below is all
    # head-batched MXU contractions.
    def split_heads(x, d):
        return jnp.stack([x[:, h * d:(h + 1) * d] for h in range(n_heads)],
                         axis=0)

    q3 = split_heads(q, d_k).astype(jnp.bfloat16)    # (H, TQ, d_k)
    k3 = split_heads(k, d_k).astype(jnp.bfloat16)    # (H, S , d_k)
    v3 = split_heads(v, d_v).astype(jnp.bfloat16)    # (H, S , d_v)

    # --- Head-batched attention (no explicit k.T; contraction on last dims).
    s = jnp.einsum('hqd,hkd->hqk', q3, k3,
                   preferred_element_type=jnp.float32)          # (H, TQ, S)
    # Plain exp (no row-max subtraction) to match the PyTorch reference
    # exactly; note it is numerically fragile for very large logits.
    scores = jnp.exp(s)
    denom = jnp.sum(scores, axis=-1, keepdims=True) + 1e-8
    attn = scores * pl.reciprocal(denom, approx=True)           # EUP reciprocal
    ctx = jnp.einsum('hqk,hkd->hqd', attn.astype(jnp.bfloat16), v3,
                     preferred_element_type=jnp.float32)        # (H, TQ, d_v)

    # --- Merge heads back to a lane-dense (TQ, H*d_v) slab; one full-width store.
    merged = jnp.concatenate([ctx[h] for h in range(n_heads)], axis=-1)
    out_ref[0] = merged.astype(out_ref.dtype)


def multi_head_self_attention(q, k, v, params, *, n_heads, d_k, d_v,
                              q_tile=512,
                              vmem_limit_bytes=48 * 1024 * 1024):
    """q, k, v: (B, S, d_model) float32.  Returns (B, S, n_heads*d_v) float32."""
    B, S, d_model = q.shape
    HK = n_heads * d_k
    HV = n_heads * d_v

    wq, bq, wk, bk, wv, bv = params

    # bf16 operands for the MXU (halves activation/weight DMA bytes).
    qb = q.astype(jnp.bfloat16)
    kb = k.astype(jnp.bfloat16)
    vb = v.astype(jnp.bfloat16)
    wqb = wq.astype(jnp.bfloat16)
    wkb = wk.astype(jnp.bfloat16)
    wvb = wv.astype(jnp.bfloat16)
    # Biases stay f32, reshaped 2D for a VMEM-friendly layout.
    bq2 = bq.reshape(1, HK).astype(jnp.float32)
    bk2 = bk.reshape(1, HK).astype(jnp.float32)
    bv2 = bv.reshape(1, HV).astype(jnp.float32)

    # Query-tile size: bounds the VMEM working set (critical on v7x's 64 MiB)
    # and provides a second parallel grid axis for megacore load balance.
    tq = S
    for cand in (q_tile, 256, 128, 64, 32, 16, 8):
        if cand <= S and S % cand == 0:
            tq = cand
            break

    kernel = functools.partial(_mhsa_kernel, n_heads=n_heads, d_k=d_k, d_v=d_v)

    return pl.pallas_call(
        kernel,
        out_shape=jax.ShapeDtypeStruct((B, S, HV), jnp.float32),
        grid_spec=pltpu.PrefetchScalarGridSpec(
            num_scalar_prefetch=0,
            grid=(B, S // tq),
            in_specs=[
                pl.BlockSpec((1, tq, d_model), lambda b, t: (b, t, 0)),   # Q tile
                pl.BlockSpec((1, S, d_model), lambda b, t: (b, 0, 0)),    # K (full S)
                pl.BlockSpec((1, S, d_model), lambda b, t: (b, 0, 0)),    # V (full S)
                pl.BlockSpec((d_model, HK), lambda b, t: (0, 0)),         # W_Q
                pl.BlockSpec((1, HK), lambda b, t: (0, 0)),               # b_Q
                pl.BlockSpec((d_model, HK), lambda b, t: (0, 0)),         # W_K
                pl.BlockSpec((1, HK), lambda b, t: (0, 0)),               # b_K
                pl.BlockSpec((d_model, HV), lambda b, t: (0, 0)),         # W_V
                pl.BlockSpec((1, HV), lambda b, t: (0, 0)),               # b_V
            ],
            out_specs=pl.BlockSpec((1, tq, HV), lambda b, t: (b, t, 0)),
        ),
        compiler_params=pltpu.CompilerParams(
            dimension_semantics=("parallel", "parallel"),
            vmem_limit_bytes=vmem_limit_bytes),
    )(qb, kb, vb, wqb, bq2, wkb, bk2, wvb, bv2)


def _xavier_uniform(key, fan_in, fan_out):
    # nn.init.xavier_uniform_ with gain=1 (symmetric, so (in,out) layout is fine).
    bound = math.sqrt(6.0 / (fan_in + fan_out))
    return jax.random.uniform(key, (fan_in, fan_out), jnp.float32, -bound, bound)


def _linear_bias(key, fan_in, fan_out):
    # PyTorch nn.Linear default bias init: U(-1/sqrt(fan_in), 1/sqrt(fan_in)).
    bound = 1.0 / math.sqrt(fan_in)
    return jax.random.uniform(key, (fan_out,), jnp.float32, -bound, bound)


def _reference(q, k, v, params, *, n_heads, d_k, d_v):
    # Pure-JAX f32 reference, mirroring the PyTorch module exactly.
    wq, bq, wk, bk, wv, bv = params
    B, S, _ = q.shape
    qs = (q @ wq + bq).reshape(B, S, n_heads, d_k).transpose(0, 2, 1, 3)
    ks = (k @ wk + bk).reshape(B, S, n_heads, d_k).transpose(0, 2, 1, 3)
    vs = (v @ wv + bv).reshape(B, S, n_heads, d_v).transpose(0, 2, 1, 3)
    scores = jnp.exp(jnp.einsum('bhqd,bhkd->bhqk', qs, ks) / math.sqrt(d_k))
    attn = scores / (jnp.sum(scores, axis=-1, keepdims=True) + 1e-8)
    ctx = jnp.einsum('bhqk,bhkd->bhqd', attn, vs)
    return ctx.transpose(0, 2, 1, 3).reshape(B, S, n_heads * d_v)


if __name__ == "__main__":
    # Small deterministic config consistent with the module's forward.
    B, S, d_model, n_heads, d_k, d_v = 2, 8, 32, 4, 8, 8

    root = jax.random.PRNGKey(0)
    kq, kk, kv, kwq, kbq, kwk, kbk, kwv, kbv = jax.random.split(root, 9)

    q = jax.random.normal(kq, (B, S, d_model), jnp.float32)
    k = jax.random.normal(kk, (B, S, d_model), jnp.float32)
    v = jax.random.normal(kv, (B, S, d_model), jnp.float32)

    params = (
        _xavier_uniform(kwq, d_model, n_heads * d_k),
        _linear_bias(kbq, d_model, n_heads * d_k),
        _xavier_uniform(kwk, d_model, n_heads * d_k),
        _linear_bias(kbk, d_model, n_heads * d_k),
        _xavier_uniform(kwv, d_model, n_heads * d_v),
        _linear_bias(kbv, d_model, n_heads * d_v),
    )

    out = multi_head_self_attention(q, k, v, params,
                                    n_heads=n_heads, d_k=d_k, d_v=d_v)
    out = jax.block_until_ready(out)

    ref = _reference(q, k, v, params, n_heads=n_heads, d_k=d_k, d_v=d_v)
    assert out.shape == (B, S, n_heads * d_v)
    # Kernel runs the matmuls in bf16 (f32 accumulation); reference is pure
    # f32, so compare with a relative-norm tolerance instead of 1e-5 allclose.
    rel_err = float(jnp.linalg.norm(out - ref) / jnp.linalg.norm(ref))
    assert rel_err < 5e-2, f"relative error too large: {rel_err}"

    print("KERNEL_OK")
</pallas_src>

<mosaic_0001>
module attributes {stable_mosaic.version = 11 : i64} {
  func.func @_mhsa_kernel(%arg0: i32, %arg1: i32, %arg2: memref<1x8x32xbf16, #tpu.memory_space<vmem>>, %arg3: memref<1x8x32xbf16, #tpu.memory_space<vmem>>, %arg4: memref<1x8x32xbf16, #tpu.memory_space<vmem>>, %arg5: memref<32x32xbf16, #tpu.memory_space<vmem>>, %arg6: memref<1x32xf32, #tpu.memory_space<vmem>>, %arg7: memref<32x32xbf16, #tpu.memory_space<vmem>>, %arg8: memref<1x32xf32, #tpu.memory_space<vmem>>, %arg9: memref<32x32xbf16, #tpu.memory_space<vmem>>, %arg10: memref<1x32xf32, #tpu.memory_space<vmem>>, %arg11: memref<1x8x32xf32, #tpu.memory_space<vmem>>) attributes {dimension_semantics = [#tpu.dimension_semantics<parallel>, #tpu.dimension_semantics<parallel>], iteration_bounds = array<i64: 2, 1>, scalar_prefetch = 0 : i64, scratch_operands = 0 : i64, tpu.core_type = #tpu.core_type<tc>, window_params = [{transform_indices = @transform_0, window_bounds = array<i64: 1, 8, 32>}, {transform_indices = @transform_1, window_bounds = array<i64: 1, 8, 32>}, {transform_indices = @transform_2, window_bounds = array<i64: 1, 8, 32>}, {pipeline_mode = #tpu.pipeline_mode<synchronous>, transform_indices = @transform_3, window_bounds = array<i64: 32, 32>}, {pipeline_mode = #tpu.pipeline_mode<synchronous>, transform_indices = @transform_4, window_bounds = array<i64: 1, 32>}, {pipeline_mode = #tpu.pipeline_mode<synchronous>, transform_indices = @transform_5, window_bounds = array<i64: 32, 32>}, {pipeline_mode = #tpu.pipeline_mode<synchronous>, transform_indices = @transform_6, window_bounds = array<i64: 1, 32>}, {pipeline_mode = #tpu.pipeline_mode<synchronous>, transform_indices = @transform_7, window_bounds = array<i64: 32, 32>}, {pipeline_mode = #tpu.pipeline_mode<synchronous>, transform_indices = @transform_8, window_bounds = array<i64: 1, 32>}, {transform_indices = @transform_9, window_bounds = array<i64: 1, 8, 32>}]} {
    %c0 = arith.constant 0 : index
    %c0_0 = arith.constant 0 : index
    %c0_1 = arith.constant 0 : index
    %0 = vector.load %arg2[%c0, %c0_0, %c0_1] : memref<1x8x32xbf16, #tpu.memory_space<vmem>>, vector<1x8x32xbf16>
    %1 = vector.shape_cast %0 : vector<1x8x32xbf16> to vector<8x32xbf16>
    %c0_2 = arith.constant 0 : index
    %c0_3 = arith.constant 0 : index
    %c0_4 = arith.constant 0 : index
    %2 = vector.load %arg3[%c0_2, %c0_3, %c0_4] : memref<1x8x32xbf16, #tpu.memory_space<vmem>>, vector<1x8x32xbf16>
    %3 = vector.shape_cast %2 : vector<1x8x32xbf16> to vector<8x32xbf16>
    %c0_5 = arith.constant 0 : index
    %c0_6 = arith.constant 0 : index
    %c0_7 = arith.constant 0 : index
    %4 = vector.load %arg4[%c0_5, %c0_6, %c0_7] : memref<1x8x32xbf16, #tpu.memory_space<vmem>>, vector<1x8x32xbf16>
    %5 = vector.shape_cast %4 : vector<1x8x32xbf16> to vector<8x32xbf16>
    %c0_8 = arith.constant 0 : index
    %c0_9 = arith.constant 0 : index
    %6 = vector.load %arg5[%c0_8, %c0_9] : memref<32x32xbf16, #tpu.memory_space<vmem>>, vector<32x32xbf16>
    %cst = arith.constant dense<0.000000e+00> : vector<8x32xf32>
    %7 = tpu.matmul %1, %6, %cst {dimension_numbers = #tpu.dot_dimension_numbers<[1], [0], [0], [1], [0, 0, 1, 1], [], []>} : vector<8x32xbf16>, vector<32x32xbf16>, vector<8x32xf32> -> vector<8x32xf32>
    %c0_10 = arith.constant 0 : index
    %c0_11 = arith.constant 0 : index
    %8 = vector.load %arg6[%c0_10, %c0_11] : memref<1x32xf32, #tpu.memory_space<vmem>>, vector<1x32xf32>
    %9 = vector.broadcast %8 : vector<1x32xf32> to vector<8x32xf32>
    %10 = arith.addf %7, %9 : vector<8x32xf32>
    %c0_12 = arith.constant 0 : index
    %c0_13 = arith.constant 0 : index
    %11 = vector.load %arg7[%c0_12, %c0_13] : memref<32x32xbf16, #tpu.memory_space<vmem>>, vector<32x32xbf16>
    %cst_14 = arith.constant dense<0.000000e+00> : vector<8x32xf32>
    %12 = tpu.matmul %3, %11, %cst_14 {dimension_numbers = #tpu.dot_dimension_numbers<[1], [0], [0], [1], [0, 0, 1, 1], [], []>} : vector<8x32xbf16>, vector<32x32xbf16>, vector<8x32xf32> -> vector<8x32xf32>
    %c0_15 = arith.constant 0 : index
    %c0_16 = arith.constant 0 : index
    %13 = vector.load %arg8[%c0_15, %c0_16] : memref<1x32xf32, #tpu.memory_space<vmem>>, vector<1x32xf32>
    %14 = vector.broadcast %13 : vector<1x32xf32> to vector<8x32xf32>
    %15 = arith.addf %12, %14 : vector<8x32xf32>
    %c0_17 = arith.constant 0 : index
    %c0_18 = arith.constant 0 : index
    %16 = vector.load %arg9[%c0_17, %c0_18] : memref<32x32xbf16, #tpu.memory_space<vmem>>, vector<32x32xbf16>
    %cst_19 = arith.constant dense<0.000000e+00> : vector<8x32xf32>
    %17 = tpu.matmul %5, %16, %cst_19 {dimension_numbers = #tpu.dot_dimension_numbers<[1], [0], [0], [1], [0, 0, 1, 1], [], []>} : vector<8x32xbf16>, vector<32x32xbf16>, vector<8x32xf32> -> vector<8x32xf32>
    %c0_20 = arith.constant 0 : index
    %c0_21 = arith.constant 0 : index
    %18 = vector.load %arg10[%c0_20, %c0_21] : memref<1x32xf32, #tpu.memory_space<vmem>>, vector<1x32xf32>
    %19 = vector.broadcast %18 : vector<1x32xf32> to vector<8x32xf32>
    %20 = arith.addf %17, %19 : vector<8x32xf32>
    %cst_22 = arith.constant 0.353553385 : f32
    %21 = vector.broadcast %cst_22 : f32 to vector<8x32xf32>
    %22 = arith.mulf %10, %21 : vector<8x32xf32>
    %23 = vector.extract_strided_slice %22 {offsets = [0, 0], sizes = [8, 8], strides = [1, 1]} : vector<8x32xf32> to vector<8x8xf32>
    %24 = vector.extract_strided_slice %22 {offsets = [0, 8], sizes = [8, 8], strides = [1, 1]} : vector<8x32xf32> to vector<8x8xf32>
    %25 = vector.extract_strided_slice %22 {offsets = [0, 16], sizes = [8, 8], strides = [1, 1]} : vector<8x32xf32> to vector<8x8xf32>
    %26 = vector.extract_strided_slice %22 {offsets = [0, 24], sizes = [8, 8], strides = [1, 1]} : vector<8x32xf32> to vector<8x8xf32>
    %27 = vector.shape_cast %23 : vector<8x8xf32> to vector<1x8x8xf32>
    %28 = vector.shape_cast %24 : vector<8x8xf32> to vector<1x8x8xf32>
    %29 = vector.shape_cast %25 : vector<8x8xf32> to vector<1x8x8xf32>
    %30 = vector.shape_cast %26 : vector<8x8xf32> to vector<1x8x8xf32>
    %31 = tpu.concatenate %27, %28, %29, %30 in 0 : vector<1x8x8xf32>, vector<1x8x8xf32>, vector<1x8x8xf32>, vector<1x8x8xf32> -> vector<4x8x8xf32>
    %32 = arith.truncf %31 : vector<4x8x8xf32> to vector<4x8x8xbf16>
    %33 = vector.extract_strided_slice %15 {offsets = [0, 0], sizes = [8, 8], strides = [1, 1]} : vector<8x32xf32> to vector<8x8xf32>
    %34 = vector.extract_strided_slice %15 {offsets = [0, 8], sizes = [8, 8], strides = [1, 1]} : vector<8x32xf32> to vector<8x8xf32>
    %35 = vector.extract_strided_slice %15 {offsets = [0, 16], sizes = [8, 8], strides = [1, 1]} : vector<8x32xf32> to vector<8x8xf32>
    %36 = vector.extract_strided_slice %15 {offsets = [0, 24], sizes = [8, 8], strides = [1, 1]} : vector<8x32xf32> to vector<8x8xf32>
    %37 = vector.shape_cast %33 : vector<8x8xf32> to vector<1x8x8xf32>
    %38 = vector.shape_cast %34 : vector<8x8xf32> to vector<1x8x8xf32>
    %39 = vector.shape_cast %35 : vector<8x8xf32> to vector<1x8x8xf32>
    %40 = vector.shape_cast %36 : vector<8x8xf32> to vector<1x8x8xf32>
    %41 = tpu.concatenate %37, %38, %39, %40 in 0 : vector<1x8x8xf32>, vector<1x8x8xf32>, vector<1x8x8xf32>, vector<1x8x8xf32> -> vector<4x8x8xf32>
    %42 = arith.truncf %41 : vector<4x8x8xf32> to vector<4x8x8xbf16>
    %43 = vector.extract_strided_slice %20 {offsets = [0, 0], sizes = [8, 8], strides = [1, 1]} : vector<8x32xf32> to vector<8x8xf32>
    %44 = vector.extract_strided_slice %20 {offsets = [0, 8], sizes = [8, 8], strides = [1, 1]} : vector<8x32xf32> to vector<8x8xf32>
    %45 = vector.extract_strided_slice %20 {offsets = [0, 16], sizes = [8, 8], strides = [1, 1]} : vector<8x32xf32> to vector<8x8xf32>
    %46 = vector.extract_strided_slice %20 {offsets = [0, 24], sizes = [8, 8], strides = [1, 1]} : vector<8x32xf32> to vector<8x8xf32>
    %47 = vector.shape_cast %43 : vector<8x8xf32> to vector<1x8x8xf32>
    %48 = vector.shape_cast %44 : vector<8x8xf32> to vector<1x8x8xf32>
    %49 = vector.shape_cast %45 : vector<8x8xf32> to vector<1x8x8xf32>
    %50 = vector.shape_cast %46 : vector<8x8xf32> to vector<1x8x8xf32>
    %51 = tpu.concatenate %47, %48, %49, %50 in 0 : vector<1x8x8xf32>, vector<1x8x8xf32>, vector<1x8x8xf32>, vector<1x8x8xf32> -> vector<4x8x8xf32>
    %52 = arith.truncf %51 : vector<4x8x8xf32> to vector<4x8x8xbf16>
    "tpu.trace_start"() <{level = 10 : i32, message = "hqd,hkd->hqk"}> : () -> ()
    %cst_23 = arith.constant dense<0.000000e+00> : vector<4x8x8xf32>
    %53 = tpu.matmul %32, %42, %cst_23 {dimension_numbers = #tpu.dot_dimension_numbers<[2], [2], [1], [1], [0, 0, 0, 1, 1, 1], [0], [0]>} : vector<4x8x8xbf16>, vector<4x8x8xbf16>, vector<4x8x8xf32> -> vector<4x8x8xf32>
    "tpu.trace_stop"() : () -> ()
    %54 = math.exp %53 : vector<4x8x8xf32>
    %cst_24 = arith.constant dense<0.000000e+00> : vector<4x8xf32>
    %55 = vector.multi_reduction <add>, %54, %cst_24 [2] : vector<4x8x8xf32> to vector<4x8xf32>
    %56 = vector.shape_cast %55 : vector<4x8xf32> to vector<4x8x1xf32>
    %cst_25 = arith.constant 9.99999993E-9 : f32
    %57 = vector.broadcast %cst_25 : f32 to vector<4x8x1xf32>
    %58 = arith.addf %56, %57 : vector<4x8x1xf32>
    %59 = tpu.reciprocal %58 {approx = true} : vector<4x8x1xf32> -> vector<4x8x1xf32>
    %60 = vector.broadcast %59 : vector<4x8x1xf32> to vector<4x8x8xf32>
    %61 = arith.mulf %54, %60 : vector<4x8x8xf32>
    %62 = arith.truncf %61 : vector<4x8x8xf32> to vector<4x8x8xbf16>
    "tpu.trace_start"() <{level = 10 : i32, message = "hqk,hkd->hqd"}> : () -> ()
    %cst_26 = arith.constant dense<0.000000e+00> : vector<4x8x8xf32>
    %63 = tpu.matmul %62, %52, %cst_26 {dimension_numbers = #tpu.dot_dimension_numbers<[2], [1], [1], [2], [0, 0, 0, 1, 1, 2], [0], [0]>} : vector<4x8x8xbf16>, vector<4x8x8xbf16>, vector<4x8x8xf32> -> vector<4x8x8xf32>
    "tpu.trace_stop"() : () -> ()
    %64 = vector.extract_strided_slice %63 {offsets = [0, 0, 0], sizes = [1, 8, 8], strides = [1, 1, 1]} : vector<4x8x8xf32> to vector<1x8x8xf32>
    %65 = vector.shape_cast %64 : vector<1x8x8xf32> to vector<8x8xf32>
    %66 = vector.extract_strided_slice %63 {offsets = [1, 0, 0], sizes = [1, 8, 8], strides = [1, 1, 1]} : vector<4x8x8xf32> to vector<1x8x8xf32>
    %67 = vector.shape_cast %66 : vector<1x8x8xf32> to vector<8x8xf32>
    %68 = vector.extract_strided_slice %63 {offsets = [2, 0, 0], sizes = [1, 8, 8], strides = [1, 1, 1]} : vector<4x8x8xf32> to vector<1x8x8xf32>
    %69 = vector.shape_cast %68 : vector<1x8x8xf32> to vector<8x8xf32>
    %70 = vector.extract_strided_slice %63 {offsets = [3, 0, 0], sizes = [1, 8, 8], strides = [1, 1, 1]} : vector<4x8x8xf32> to vector<1x8x8xf32>
    %71 = vector.shape_cast %70 : vector<1x8x8xf32> to vector<8x8xf32>
    %72 = tpu.concatenate %65, %67, %69, %71 in 1 : vector<8x8xf32>, vector<8x8xf32>, vector<8x8xf32>, vector<8x8xf32> -> vector<8x32xf32>
    %c0_27 = arith.constant 0 : index
    %c0_28 = arith.constant 0 : index
    %c0_29 = arith.constant 0 : index
    %73 = vector.load %arg11[%c0_27, %c0_28, %c0_29] : memref<1x8x32xf32, #tpu.memory_space<vmem>>, vector<1x8x32xf32>
    %74 = vector.shape_cast %73 : vector<1x8x32xf32> to vector<8x32xf32>
    %75 = vector.shape_cast %72 : vector<8x32xf32> to vector<1x8x32xf32>
    tpu.vector_store %arg11[%c0_27, %c0_28, %c0_29], %75 {strides = array<i32>} : memref<1x8x32xf32, #tpu.memory_space<vmem>>, vector<1x8x32xf32>,
    return
  }
  func.func @transform_0(%arg0: i32, %arg1: i32) -> (i32, i32, i32) {
    %c0_i32 = arith.constant 0 : i32
    %c0_i32_0 = arith.constant 0 : i32
    return %arg0, %arg1, %c0_i32 : i32, i32, i32
  }
  func.func @transform_1(%arg0: i32, %arg1: i32) -> (i32, i32, i32) {
    %c0_i32 = arith.constant 0 : i32
    %c0_i32_0 = arith.constant 0 : i32
    %c0_i32_1 = arith.constant 0 : i32
    return %arg0, %c0_i32, %c0_i32_0 : i32, i32, i32
  }
  func.func @transform_2(%arg0: i32, %arg1: i32) -> (i32, i32, i32) {
    %c0_i32 = arith.constant 0 : i32
    %c0_i32_0 = arith.constant 0 : i32
    %c0_i32_1 = arith.constant 0 : i32
    return %arg0, %c0_i32, %c0_i32_0 : i32, i32, i32
  }
  func.func @transform_3(%arg0: i32, %arg1: i32) -> (i32, i32) {
    %c0_i32 = arith.constant 0 : i32
    %c0_i32_0 = arith.constant 0 : i32
    %c0_i32_1 = arith.constant 0 : i32
    return %c0_i32, %c0_i32_0 : i32, i32
  }
  func.func @transform_4(%arg0: i32, %arg1: i32) -> (i32, i32) {
    %c0_i32 = arith.constant 0 : i32
    %c0_i32_0 = arith.constant 0 : i32
    %c0_i32_1 = arith.constant 0 : i32
    return %c0_i32, %c0_i32_0 : i32, i32
  }
  func.func @transform_5(%arg0: i32, %arg1: i32) -> (i32, i32) {
    %c0_i32 = arith.constant 0 : i32
    %c0_i32_0 = arith.constant 0 : i32
    %c0_i32_1 = arith.constant 0 : i32
    return %c0_i32, %c0_i32_0 : i32, i32
  }
  func.func @transform_6(%arg0: i32, %arg1: i32) -> (i32, i32) {
    %c0_i32 = arith.constant 0 : i32
    %c0_i32_0 = arith.constant 0 : i32
    %c0_i32_1 = arith.constant 0 : i32
    return %c0_i32, %c0_i32_0 : i32, i32
  }
  func.func @transform_7(%arg0: i32, %arg1: i32) -> (i32, i32) {
    %c0_i32 = arith.constant 0 : i32
    %c0_i32_0 = arith.constant 0 : i32
    %c0_i32_1 = arith.constant 0 : i32
    return %c0_i32, %c0_i32_0 : i32, i32
  }
  func.func @transform_8(%arg0: i32, %arg1: i32) -> (i32, i32) {
    %c0_i32 = arith.constant 0 : i32
    %c0_i32_0 = arith.constant 0 : i32
    %c0_i32_1 = arith.constant 0 : i32
    return %c0_i32, %c0_i32_0 : i32, i32
  }
  func.func @transform_9(%arg0: i32, %arg1: i32) -> (i32, i32, i32) {
    %c0_i32 = arith.constant 0 : i32
    %c0_i32_0 = arith.constant 0 : i32
    return %arg0, %arg1, %c0_i32 : i32, i32, i32
  }
}

</mosaic_0001>

<bundles_post_ra>
// kernel: tpu_custom_call.1
= control target key start
LH: loop header
LB: loop body
LE: loop exit
PB: predicated region body
PF: predicated region fallthrough
CT: control target
= control target key end

     0   :  { %s2273_s0 = inlined_call_operand.hbm [shape: bf16[2,8,32], index: 0, kind: input, shape index: {}]   ;;  %s2274_s1 = inlined_call_operand.hbm [shape: bf16[2,8,32], index: 1, kind: input, shape index: {}]   ;;  %s2275_s2 = inlined_call_operand.hbm [shape: bf16[2,8,32], index: 2, kind: input, shape index: {}]   ;;  %s2276_s3 = inlined_call_operand.hbm [shape: bf16[32,32], index: 3, kind: input, shape index: {}]   ;;  %s2277_s4 = inlined_call_operand.vmem [shape: f32[1,32], index: 4, kind: input, shape index: {}]   ;;  %s2278_s5 = inlined_call_operand.vmem [shape: bf16[32,32], index: 5, kind: input, shape index: {}]   ;;  %s2279_s6 = inlined_call_operand.vmem [shape: f32[1,32], index: 6, kind: input, shape index: {}]   ;;  %s2280_s7 = inlined_call_operand.hbm [shape: bf16[32,32], index: 7, kind: input, shape index: {}]   ;;  %s2281_s8 = inlined_call_operand.vmem [shape: f32[1,32], index: 8, kind: input, shape index: {}]   ;;  %s2282_s9 = inlined_call_operand.hbm [shape: f32[2,8,32], index: 9, kind: output, shape index: {}]  }
   0x1   :  { %2304 = sst [smem:[#allocation22_spill]] %s2274_s1 }
   0x2   :  { %2305 = sst [smem:[#allocation23_spill]] %s2276_s3 }
   0x3   :  { %2306 = sst [smem:[#allocation24_spill]] %s2280_s7 }
   0x4   :  { %2307 = sst [smem:[#allocation25_spill]] %s2282_s9 }
   0x5   :  { %14 = vsyncpa [#allocation3], 0 }
   0x6   :  { %16 = vsyncpa [#allocation3 + $0x1], 0 }
   0x7   :  { %17 = vsyncpa [#allocation6], 0 }
   0x8   :  { %19 = vsyncpa [#allocation6 + $0x1], 0 }
   0x9   :  { %20 = vsyncpa [#allocation9], 0 }
   0xa   :  { %21 = vsyncpa [#allocation4], 0 }
   0xb   :  { %23 = vsyncpa [#allocation4 + $0x1], 0  ;;  %s1861_s30 = smov 0   ;;  %s1863_s10 = smov 0  }
   0xc   :  { %s1865_s11 = smov 0   ;;  %s1867_s12 = smov 0  }
   0xd   :  { %s1869_s13 = smov 0   ;;  %s1871_s14 = smov 0  }
   0xe LB: > { %2308 = sst [smem:[#allocation16_spill]] %s1773_s30  ;;  %s1892_s15 = sadd.s32 4294967295, %s1793_s14   ;;  %s1793_s14 = sphi %s1871_s14, %s29_s14   ;;  %s1789_s13 = sphi %s1869_s13, %s2347_s13   ;;  %s1785_s12 = sphi %s1867_s12, %s2346_s12   ;;  %s1781_s11 = sphi %s1865_s11, %s2350_s11   ;;  %s1777_s10 = sphi %s1863_s10, %s2349_s10   ;;  %s1773_s30 = sphi %s1861_s30, %s2348_s30  }
   0xf   : > { %2309 = sst [smem:[#allocation17_spill]] %s1789_s13  ;;  %s1293_s16 = sadd.s32 4294967294, %s1793_s14  }
  0x10   : > { %2310 = sst [smem:[#allocation18_spill]] %s1793_s14  ;;  %p63_p0 = scmp.ne.s32.totalorder %s1777_s10, %s1773_s30 }
  0x11   : > { %p2283_p1 = scmp.eq.s32.totalorder %s1892_s15, 0  ;;  %p273_p3 = scmp.eq.s32.totalorder %s1293_s16, 1 }
  0x12   : > { %p1294_p5 = scmp.ge.s32.totalorder %s1793_s14, 1  ;;  %p280_p7 = scmp.lt.s32.totalorder %s1793_s14, 3 }
  0x13   : > { %p1901_p4 = por %p2283_p1, %p63_p0  ;;  %p1906_p6 = por %p273_p3, %p63_p0 }
  0x14   : > { %p1911_p8 = pnand %p1294_p5, %p280_p7  ;;  %s1795_s20 = smov [#allocation8]  }
  0x15   : > { %s2311_s17 = scalar_select %p1901_p4, 1, 0 }
  0x16   : > { %s2312_s18 = scalar_select %p1906_p6, 1, 0 }
  0x17   : > { %s2314_s19 = scalar_select %p1911_p8, 1, 0 }
  0x18   : > { %2313 = sst [smem:[#allocation19_spill]] %s2312_s18  ;;  %s292_s21 = sshll.u32 %s1795_s20, 4  ;;  %s293_s21 = int_to_ptr.vmem [resolvable:$true] %s292_s21 }
  0x19   : > { %p1448_p9 = pneg %p1911_p8  ;;  %s41_s23 = sadd.s32 1, %s1789_s13 }
  0x1a   : > { %s2316_s3 = sld [smem:[#allocation23_spill]] }
  0x1b   : > { %p1920_p11 = pnand %p1448_p9, %p2283_p1 }
  0x1d   : > { %s2315_s22 = scalar_select %p1920_p11, 1, 0 }
  0x1e   : > { %p2296_p13 = pneg %p1920_p11 }
  0x20   : > { %s1557_s26 = scalar_lea.hbm %s2316_s3, 256 }
  0x21   : > { %p1558_p12 = scmp.ne.s32.totalorder %s2316_s3, %s1557_s26  ;;  %p1564_p5 = scmp.lt.u32.totalorder %s1557_s26, %s2316_s3 }
  0x23   : > { %p1560_p0 = pnand %p2296_p13, %p1558_p12 }
  0x25   : > { %p1561_p3 = pneg %p1560_p0 }
  0x27   : > { %p1566_p7 = pnand %p1564_p5, %p1561_p3 }
  0x29   : > { %1569 = shalt.err (!%p1566_p7)
}
  0x2a   : > { %s1570_s20 = scalar_lea.vmem %s293_s21, 256  ;;  %p1578_p2 = scmp.lt.s32.totalorder %s293_s21, %s293_s21 }
  0x2b   : > { %p1571_p9 = scmp.ne.s32.totalorder %s293_s21, %s1570_s20  ;;  %p1579_p6 = scmp.lt.s32.totalorder %s1570_s20, %s1570_s20 }
  0x2d   : > { %p1573_p10 = pnand %p1571_p9, %p2296_p13  ;;  %p1580_p4 = por %p1579_p6, %p1578_p2 }
  0x2f   : > { %p1574_p1 = pneg %p1573_p10 }
  0x31   : > { %p1581_p8 = pnand %p1580_p4, %p1574_p1 }
  0x33   : > { %1584 = shalt.err (!%p1581_p8)
}
  0x34   : > { %s2286_s24 = smov 64   ;;  %s2287_s25 = smov 4  }
  0x35   : > { %1451 = dma.hbm_to_vmem [thread:$0]  (!%p1920_p11), %s2316_s3, 256, %s293_s21, [#allocation9], %s2286_s24, %s2286_s24, %s2287_s25  }
  0x36   : > { %p43_p1 = scmp.ge.s32.totalorder %s41_s23, 2  ;;  %s50_s28 = sadd.s32 1, %s1781_s11 }
  0x37   : > { %p57_p2 = scmp.ne.s32.totalorder %s1781_s11, %s1777_s10  ;;  %p58_p4 = scmp.eq.s32.totalorder %s1793_s14, 0 }
  0x38   : > { %s2352_s23 = smov (%p43_p1, %s41_s23), 0  ;;  %p2318_p8 = scmp.eq.s32.totalorder %s1892_s15, 1 }
  0x39   : > { %2317 = sst [smem:[#allocation20_spill]] %s2352_s23  ;;  %p59_p6 = por %p58_p4, %p57_p2 }
  0x3a   : > { %p1958_p10 = por %p2318_p8, %p57_p2  ;;  %s45_s16 = ssub.s32 %s1789_s13, %s2352_s23 }
  0x3b   : > { %p1471_p12 = scmp.lt.s32.totalorder %s1793_s14, 2  ;;  %p48_p0 = scmp.eq.s32.totalorder %s45_s16, 0 }
  0x3c   : > { %s2319_s29 = scalar_select %p1958_p10, 1, 0 }
  0x3d   : > { %s2289_s20 = sand.u32 1, %s1781_s11   ;;  %s1971_s26 = sshll.u32 %s1789_s13, 6 }
  0x3e   : > { %s1968_s21 = sshll.u32 %s2289_s20, 2  ;;  %p1976_p3 = pnand %p1471_p12, %p59_p6 }
  0x3f   : > { %s1974_s27 = scalar_select %p48_p0, %s1781_s11, %s50_s28  }
  0x40   : > { %s2321_s24 = scalar_select %p1976_p3, 1, 0 }
  0x41   : > { %2320 = sst [smem:[#allocation21_spill]] %s1974_s27  ;;  %s350_s25 = sand.u32 1, %s1793_s14  }
  0x42   : > { %s2322_s1 = sld [smem:[#allocation22_spill]]  ;;  %s354_s20 = scalar_lea.vmem [#allocation5], %s1968_s21 }
  0x43   : > { %s361_s13 = sshll.u32 %s354_s20, 4  ;;  %s1798_s28 = smov [#allocation10]   ;;  %s1988_s13 = int_to_ptr.vmem [resolvable:$true] %s361_s13 }
  0x44   : > { %s1990_s27 = sshll.u32 %s1798_s28, 4  ;;  %s1992_s18 = scalar_lea.sflag [#allocation6], %s350_s25  ;;  %s315_s27 = int_to_ptr.vmem [resolvable:$true] %s1990_s27 }
  0x45   : > { %p1998_p7 = pneg %p1976_p3 }
  0x47   : > { %s2323_s3 = scalar_select %p1998_p7, 1, 0 }
  0x48   : > { %s1985_s16 = scalar_lea.hbm %s2322_s1, %s1971_s26  ;;  %s1590_s14 = scalar_lea.hbm %s2322_s1, 128 }
  0x49   : > { %s1585_s30 = scalar_lea.hbm %s1985_s16, 64  ;;  %p1591_p2 = scmp.lt.u32.totalorder %s1985_s16, %s2322_s1 }
  0x4a   : > { %p1586_p5 = scmp.ne.s32.totalorder %s1985_s16, %s1585_s30  ;;  %p1592_p4 = scmp.lt.u32.totalorder %s1590_s14, %s1585_s30 }
  0x4b   : > { %p1594_p8 = scmp.lt.u32.totalorder %s1585_s30, %s1985_s16 }
  0x4c   : > { %p1588_p9 = pnand %p1998_p7, %p1586_p5  ;;  %p1593_p6 = por %p1592_p4, %p1591_p2 }
  0x4e   : > { %p1589_p1 = pneg %p1588_p9  ;;  %p1595_p12 = por %p1594_p8, %p1593_p6 }
  0x50   : > { %p1596_p0 = pnand %p1595_p12, %p1589_p1 }
  0x52   : > { %1599 = shalt.err (!%p1596_p0)
}
  0x53   : > { %s1600_s25 = scalar_lea.vmem %s1988_s13, 64  ;;  %s1799_s23 = smov [#allocation5]  }
  0x54   : > { %p1601_p5 = scmp.ne.s32.totalorder %s1988_s13, %s1600_s25  ;;  %s1605_s20 = sshll.u32 %s1799_s23, 4  ;;  %s1606_s20 = int_to_ptr.vmem [resolvable:$false] %s1605_s20 }
  0x55   : > { %s1607_s9 = scalar_lea.vmem %s1606_s20, 128  ;;  %p1608_p10 = scmp.lt.s32.totalorder %s1988_s13, %s1606_s20 }
  0x56   : > { %p1603_p9 = pnand %p1601_p5, %p1998_p7  ;;  %p1609_p11 = scmp.lt.s32.totalorder %s1607_s9, %s1600_s25 }
  0x58   : > { %p1604_p13 = pneg %p1603_p9  ;;  %p1610_p2 = por %p1609_p11, %p1608_p10 }
  0x5a   : > { %p1611_p4 = pnand %p1610_p2, %p1604_p13 }
  0x5c   : > { %1614 = shalt.err (!%p1611_p4)
}
  0x5d   : > { %1461 = dma.hbm_to_vmem [thread:$0]  (!%p1976_p3), %s1985_s16, 64, %s1988_s13, %s1992_s18  }
  0x5e   : > { %s2324_s7 = sld [smem:[#allocation24_spill]]  ;;  %p2325_p11 = scmp.ne.s32.totalorder %s2315_s22, 0 }
  0x60   : > { %p2326_p13 = pneg %p2325_p11 }
  0x64   : > { %s1615_s28 = scalar_lea.hbm %s2324_s7, 256 }
  0x65   : > { %p1616_p1 = scmp.ne.s32.totalorder %s2324_s7, %s1615_s28  ;;  %p1622_p8 = scmp.lt.u32.totalorder %s1615_s28, %s2324_s7 }
  0x67   : > { %p1618_p10 = pnand %p1616_p1, %p2326_p13 }
  0x69   : > { %p1619_p6 = pneg %p1618_p10 }
  0x6b   : > { %p1624_p12 = pnand %p1622_p8, %p1619_p6 }
  0x6d   : > { %1627 = shalt.err (!%p1624_p12)
}
  0x6e   : > { %s1628_s13 = scalar_lea.vmem %s315_s27, 256  ;;  %p2327_p5 = pmov %p2326_p13 }
  0x6f   : > { %p1629_p0 = scmp.ne.s32.totalorder %s315_s27, %s1628_s13  ;;  %p1636_p4 = scmp.lt.s32.totalorder %s315_s27, %s315_s27 }
  0x70   : > { %p1637_p3 = scmp.lt.s32.totalorder %s1628_s13, %s1628_s13 }
  0x71   : > { %p1631_p9 = pnand %p1629_p0, %p2327_p5 }
  0x72   : > { %p1638_p7 = por %p1637_p3, %p1636_p4 }
  0x73   : > { %p1632_p2 = pneg %p1631_p9 }
  0x75   : > { %p1639_p1 = pnand %p1638_p7, %p1632_p2 }
  0x77   : > { %1642 = shalt.err (!%p1639_p1)
}
  0x78   : > { %s2328_s1 = smov 4   ;;  %s2329_s16 = smov 64  }
  0x79   : > { %1454 = dma.hbm_to_vmem [thread:$0]  (!%p2325_p11), %s2324_s7, 256, %s315_s27, [#allocation9], %s2329_s16, %s2329_s16, %s2328_s1  }
  0x7a   : > { %s2050_s23 = scalar_lea.hbm %s2273_s0, %s1971_s26  ;;  %s335_s22 = scalar_lea.vmem [#allocation2], %s1968_s21 }
  0x7b   : > { %s343_s25 = sshll.u32 %s335_s22, 4  ;;  %s2059_s9 = scalar_lea.hbm %s2275_s2, %s1971_s26  ;;  %s2053_s25 = int_to_ptr.vmem [resolvable:$true] %s343_s25 }
  0x7c   : > { %s2330_s30 = sand.u32 1, %s1781_s11   ;;  %s1643_s1 = scalar_lea.hbm %s2050_s23, 64 }
  0x7d   : > { %s332_s27 = scalar_lea.sflag [#allocation3], %s2330_s30  ;;  %p1644_p3 = scmp.ne.s32.totalorder %s2050_s23, %s1643_s1 }
  0x7e   : > { %p2331_p7 = scmp.ne.s32.totalorder %s2323_s3, 0  ;;  %s1648_s28 = scalar_lea.hbm %s2273_s0, 128 }
  0x7f   : > { %p1649_p10 = scmp.lt.u32.totalorder %s2050_s23, %s2273_s0  ;;  %p1650_p6 = scmp.lt.u32.totalorder %s1648_s28, %s1643_s1 }
  0x80   : > { %p1646_p11 = pnand %p1644_p3, %p2331_p7  ;;  %p1652_p12 = scmp.lt.u32.totalorder %s1643_s1, %s2050_s23 }
  0x81   : > { %p1651_p8 = por %p1650_p6, %p1649_p10 }
  0x82   : > { %p1647_p13 = pneg %p1646_p11 }
  0x83   : > { %p1653_p0 = por %p1652_p12, %p1651_p8 }
  0x85   : > { %p1654_p5 = pnand %p1653_p0, %p1647_p13 }
  0x87   : > { %1657 = shalt.err (!%p1654_p5)
}
  0x88   : > { %s1658_s26 = scalar_lea.vmem %s2053_s25, 64  ;;  %s1800_s20 = smov [#allocation2]  }
  0x89   : > { %p1659_p9 = scmp.ne.s32.totalorder %s2053_s25, %s1658_s26  ;;  %s1663_s13 = sshll.u32 %s1800_s20, 4  ;;  %s1664_s13 = int_to_ptr.vmem [resolvable:$false] %s1663_s13 }
  0x8a   : > { %s1665_s7 = scalar_lea.vmem %s1664_s13, 128  ;;  %p1666_p1 = scmp.lt.s32.totalorder %s2053_s25, %s1664_s13 }
  0x8b   : > { %p1661_p2 = pnand %p1659_p9, %p2331_p7  ;;  %p1667_p3 = scmp.lt.s32.totalorder %s1665_s7, %s1658_s26 }
  0x8d   : > { %p1662_p4 = pneg %p1661_p2  ;;  %p1668_p11 = por %p1667_p3, %p1666_p1 }
  0x8f   : > { %p1669_p10 = pnand %p1668_p11, %p1662_p4 }
  0x91   : > { %1672 = shalt.err (!%p1669_p10)
}
  0x92   : > { %p2332_p13 = scmp.ne.s32.totalorder %s2321_s24, 0  ;;  %s372_s30 = scalar_lea.vmem [#allocation7], %s1968_s21 }
  0x93   : > { %s379_s1 = sshll.u32 %s372_s30, 4  ;;  %s1673_s16 = scalar_lea.hbm %s2059_s9, 64  ;;  %s380_s1 = int_to_ptr.vmem [resolvable:$true] %s379_s1 }
  0x94   : > { %1458 = dma.hbm_to_vmem [thread:$0]  (!%p2332_p13), %s2050_s23, 64, %s2053_s25, %s332_s27  }
  0x95   : > { %p1674_p6 = scmp.ne.s32.totalorder %s2059_s9, %s1673_s16  ;;  %s1678_s22 = scalar_lea.hbm %s2275_s2, 128 }
  0x96   : > { %p1679_p0 = scmp.lt.u32.totalorder %s2059_s9, %s2275_s2  ;;  %p1680_p5 = scmp.lt.u32.totalorder %s1678_s22, %s1673_s16 }
  0x97   : > { %p1676_p8 = pnand %p1674_p6, %p2331_p7  ;;  %p1682_p2 = scmp.lt.u32.totalorder %s1673_s16, %s2059_s9 }
  0x98   : > { %p1681_p9 = por %p1680_p5, %p1679_p0 }
  0x99   : > { %p1677_p12 = pneg %p1676_p8 }
  0x9a   : > { %p1683_p4 = por %p1682_p2, %p1681_p9 }
  0x9c   : > { %p1684_p1 = pnand %p1683_p4, %p1677_p12 }
  0x9e   : > { %1687 = shalt.err (!%p1684_p1)
}
  0x9f   : > { %s1688_s21 = scalar_lea.vmem %s380_s1, 64  ;;  %s1801_s23 = smov [#allocation7]  }
  0xa0   : > { %p1689_p3 = scmp.ne.s32.totalorder %s380_s1, %s1688_s21  ;;  %s1693_s25 = sshll.u32 %s1801_s23, 4  ;;  %s1694_s25 = int_to_ptr.vmem [resolvable:$false] %s1693_s25 }
  0xa1   : > { %s1695_s27 = scalar_lea.vmem %s1694_s25, 128  ;;  %p1696_p6 = scmp.lt.s32.totalorder %s380_s1, %s1694_s25 }
  0xa2   : > { %p1691_p11 = pnand %p1689_p3, %p2331_p7  ;;  %p1697_p8 = scmp.lt.s32.totalorder %s1695_s27, %s1688_s21 }
  0xa4   : > { %p1692_p10 = pneg %p1691_p11  ;;  %p1698_p13 = por %p1697_p8, %p1696_p6 }
  0xa6   : > { %p1699_p0 = pnand %p1698_p13, %p1692_p10 }
  0xa8   : > { %1702 = shalt.err (!%p1699_p0)
}
  0xa9   : > { %p2333_p5 = scmp.ne.s32.totalorder %s2321_s24, 0  ;;  %p2334_p12 = scmp.ne.s32.totalorder %s2314_s19, 0 }
  0xaa   : > { %s2106_s3 = sand.u32 (!%p2334_p12), 1, %s1777_s10   ;;  %p2335_p7 = scmp.ne.s32.totalorder (!%p2334_p12), %s2311_s17, 0 }
  0xab   : > { %1464 = dma.hbm_to_vmem [thread:$0]  (!%p2333_p5), %s2059_s9, 64, %s380_s1, %s1992_s18  }
  0xac   : > { %388 = sbr.rel (%p2334_p12) target bundleno = 1270 (0x4f6), region = 56  ;;  %s2109_s13 = sshll.u32 (!%p2334_p12), %s2106_s3, 2 }
  0xad   : > { %s391_s7 = scalar_lea.sflag (!%p2334_p12), [#allocation3], %s2106_s3  ;;  %s394_s30 = scalar_lea.vmem (!%p2334_p12), [#allocation2], %s2109_s13 }
  0xb3   : > { %1756 = dma.done.wait (%p2335_p7), %s391_s7, 64  }
  0xb4   : > { %1758 = vsyncadd (%p2335_p7), %s391_s7, 4294967232  ;;  %s399_s18 = sand.u32 1, %s1892_s15   ;;  %s403_s24 = scalar_lea.vmem [#allocation5], %s2109_s13 }
  0xb5   : > { %s400_s19 = scalar_lea.sflag [#allocation6], %s399_s18 }
  0xb6   : > { %1760 = dma.done.wait (%p2335_p7), %s400_s19, 128  }
  0xb7   : > { %1762 = vsyncadd (%p2335_p7), %s400_s19, 4294967168  ;;  %s412_s9 = scalar_lea.vmem [#allocation7], %s2109_s13  ;;  %p2336_p13 = scmp.eq.s32.totalorder %s1892_s15, 0 }
  0xb9   : > { %1764 = dma.done.wait (%p2336_p13), [#allocation9], 512   ;;  %p2337_p9 = pmov %p2336_p13 }
  0xba   : > { %v1802_v0 = vmov 0.0   ;;  %vm1803_vm0 = vmmov 0   ;;  %v1535_v1 = vld [vmem:[#allocation8] sm:$0xff]   ;;  %v1536_v2 = vld [vmem:[%s2278_s5] sm:$0xff]   ;;  %v1537_v3 = vld [vmem:[#allocation8 + $0x8] sm:$0xff]   ;;  %vm492_vm1 = vcmask 261120  }
  0xbb   : > { %1766 = vsyncadd (%p2337_p9), [#allocation9], 4294966784  ;;  %1360 = vmatprep.subr.bf16.mxu0 %v1802_v0  ;;  %1368 = vmatprep.subr.bf16.mxu1 %v1802_v0  ;;  %v1538_v4 = vld [vmem:[%s2278_s5 + $0x8] sm:$0xff]   ;;  %v466_v5 = vld [vmem:[%s394_s30] sm:$0xf]  ;;  %vm711_vm2 = vcmask 64512  }
  0xbc   : > { %1364 = vmatprep.mubr.msk.bf16.mxu0 %vm1803_vm0, %v1802_v0  ;;  %1372 = vmatprep.mubr.msk.bf16.mxu1 %vm1803_vm0, %v1802_v0  ;;  %v467_v6 = vld [vmem:[%s403_s24] sm:$0xf]  ;;  %v1540_v8 = vld [vmem:[#allocation10 + $0x8] sm:$0xff]   ;;  %s1804_s20 = smov 120   ;;  %s1805_s21 = smov 112   ;;  %vm935_vm3 = vcmask 1043456  }
  0xbd   : > { %1361 = vmatpush3.bf16.msra.mxu0 %v1535_v1  ;;  %1369 = vmatpush3.bf16.msra.mxu1 %v1536_v2  ;;  %v1539_v7 = vld [vmem:[#allocation10] sm:$0xff]   ;;  %v468_v9 = vld [vmem:[%s412_s9] sm:$0xf]  ;;  %s1806_s23 = smov 104   ;;  %s1807_s13 = smov 8   ;;  %vm1130_vm4 = vcmask 130048  }
  0xbe   : > { %1362 = vmatprep.subr.bf16.mxu0 %v1802_v0  ;;  %1370 = vmatprep.subr.bf16.mxu1 %v1802_v0  ;;  %v1311_v10 = vld [vmem:[%s2277_s4] ss:$0 sm:$0xff]  ;;  %s1808_s7 = smov 16   ;;  %s1809_s30 = smov 24   ;;  %vm1132_vm5 = vcmask 195584  }
  0xbf   : > { %v1315_v11 = vld [vmem:[%s2279_s6] ss:$0 sm:$0xff]  ;;  %s1310_s18 = sshll.u32 %s2106_s3, 3  ;;  %s1332_s19 = sshll.u32 %s1785_s12, 7 }
  0xc0   : > { %v1319_v26 = vld [vmem:[%s2281_s8] ss:$0 sm:$0xff]  ;;  %s464_s24 = scalar_lea.vmem [#allocation11], %s1310_s18  ;;  %s2338_s15 = sld [smem:[#allocation25_spill]] }
  0xc1   : > { %1363 = vmatpush3.bf16.msra.mxu0 %v1537_v3  ;;  %1371 = vmatpush3.bf16.msra.mxu1 %v1538_v4  ;;  %s1150_s9 = sshll.u32 %s464_s24, 4  ;;  %s1136_s12 = scalar_lea.sflag [#allocation4], %s2106_s3  ;;  %s2225_s9 = int_to_ptr.vmem [resolvable:$true] %s1150_s9 }
  0xc2   : > { %1376 = vmatprep.subr.bf16.mxu0 %v1802_v0  ;;  %1384 = vmatprep.subr.bf16.mxu1 %v1802_v0  ;;  %s1703_s14 = scalar_lea.vmem %s2225_s9, 128  ;;  %p2339_p4 = scmp.ne.s32.totalorder %s2319_s29, 0 }
  0xc3   : > { %p1704_p2 = scmp.ne.s32.totalorder %s2225_s9, %s1703_s14  ;;  %s1810_s28 = smov [#allocation11]  }
  0xc4   : > { %1365 = vmatmul.mubr.msk.bf16.vlgmr.msra.gmra.mrb[0].mxu0 %vm492_vm1, %v466_v5  ;;  %1373 = vmatmul.mubr.msk.bf16.vlgmr.msra.gmra.mrb[0].mxu1 %vm492_vm1, %v467_v6  ;;  %s1707_s22 = sshll.u32 %s1810_s28, 4  ;;  %s1708_s22 = int_to_ptr.vmem [resolvable:$false] %s1707_s22 }
  0xc5   : > { %1380 = vmatprep.mubr.msk.bf16.mxu0 %vm1803_vm0, %v1802_v0  ;;  %1386 = vmatprep.mubr.msk.bf16.mxu1 %vm1803_vm0, %v1802_v0  ;;  %p1705_p1 = pnand %p1704_p2, %p2339_p4  ;;  %s1709_s26 = scalar_lea.vmem %s1708_s22, 256 }
  0xc6   : > { %1377 = vmatpush3.bf16.msra.mxu0 %v1539_v7  ;;  %s2223_s16 = scalar_lea.hbm %s2338_s15, %s1332_s19  ;;  %p1710_p11 = scmp.lt.s32.totalorder %s2225_s9, %s1708_s22 }
  0xc7   : > { %1378 = vmatprep.subr.bf16.mxu0 %v1802_v0  ;;  %p1706_p3 = pneg %p1705_p1  ;;  %p1711_p10 = scmp.lt.s32.totalorder %s1709_s26, %s1703_s14 }
  0xc9   : > { %p1712_p6 = por %p1711_p10, %p1710_p11 }
  0xca   : > { %1379 = vmatpush3.bf16.msra.mxu0 %v1540_v8 }
  0xcb   : > { %1390 = vmatprep.subr.bf16.mxu0 %v1802_v0  ;;  %p1713_p8 = pnand %p1712_p6, %p1706_p3 }
  0xcd   : > { %1381 = vmatmul.mubr.msk.bf16.vlgmr.msra.gmra.mrb[4].mxu0 %vm492_vm1, %v468_v9 }
  0xce   : > { %1392 = vmatprep.mubr.msk.bf16.mxu0 %vm1803_vm0, %v1802_v0 }
 0x197   : > { %v530_v12 = vpop.f32.mrb[0].mxu0  ;;  %v596_v14 = vpop.f32.mrb[0].mxu1 }
 0x198   : > { %v531_v13 = vadd.f32 %v1311_v10, %v530_v12  ;;  %v1366_v15 = vpop.f32.mrb[1].mxu0  ;;  %v597_v16 = vadd.f32 %v1315_v11, %v596_v14  ;;  %v1374_v17 = vpop.f32.mrb[1].mxu1 }
 0x199   : > { %v533_v18 = vpop.f32.mrb[2].mxu0  ;;  %v599_v20 = vpop.f32.mrb[2].mxu1 }
 0x19a   : > { %v668_v19 = vmul.f32 0.35355338, %v531_v13  ;;  %v1367_v21 = vpop.f32.mrb[3].mxu0  ;;  %684 = vrot.lane.b32.xlu0 %v597_v16, %s1804_s20  ;;  %v1375_v22 = vpop.f32.mrb[3].mxu1  ;;  %v693_v23 = vpack.c.bf16 %v597_v16, %v597_v16 }
 0x19c   : > { %670 = vrot.lane.b32.xlu1 %v668_v19, %s1804_s20  ;;  %v716_v24 = vsel %vm711_vm2, %v693_v23, 0  ;;  %v679_v25 = vpack.c.bf16 %v668_v19, %v668_v19 }
 0x19d   : > { %1385 = vmatpush3.bf16.xpose.msra.mxu1 %v716_v24 }
 0x19e   : > { %687 = vrot.lane.b32.xlu0 %v597_v16, %s1805_s21  ;;  %1396 = vmatprep.subr.bf16.mxu1 %v1802_v0 }
 0x1a0   : > { %690 = vrot.lane.b32.xlu1 %v597_v16, %s1806_s23  ;;  %v662_v27 = vpop.f32.mrb[4].mxu0 }
 0x1a1   : > { %v2175_v28 = vadd.f32 %v1319_v26, %v662_v27  ;;  %v1382_v29 = vpop.f32.mrb[5].mxu0 }
 0x1a2   : > { %673 = vrot.lane.b32.xlu0 %v668_v19, %s1805_s21  ;;  %v665_v30 = vpop.f32.mrb[6].mxu0 }
 0x1a3   : > { %v1383_v31 = vpop.f32.mrb[7].mxu0  ;;  %v707_v42 = vpack.c.bf16 %v2175_v28, %v2175_v28 }
 0x1a4   : > { %676 = vrot.lane.b32.xlu1 %v668_v19, %s1806_s23  ;;  %1387 = vmatmul.mubr.msk.bf16.vlgmr.msra.gmra.mrb[4].mxu1 %vm711_vm2, %v679_v25 }
 0x1a5   : > { %1398 = vmatprep.mubr.msk.bf16.mxu1 %vm1803_vm0, %v1802_v0  ;;  %v937_v46 = vsel %vm935_vm3, %v707_v42, 0 }
 0x1a8   : > { %698 = vrot.lane.b32.xlu1 %v2175_v28, %s1804_s20 }
 0x20c   : > { %v685_v32 = vpop.permute.xlu0 %684 }
 0x20d   : > { %v694_v33 = vpack.c.bf16 %v685_v32, %v685_v32 }
 0x20e   : > { %v671_v34 = vpop.permute.xlu1 %670 }
 0x20f   : > { %v762_v35 = vsel %vm711_vm2, %v694_v33, 0  ;;  %v680_v41 = vpack.c.bf16 %v671_v34, %v671_v34 }
 0x210   : > { %v688_v36 = vpop.permute.xlu0 %687  ;;  %1391 = vmatpush3.bf16.xpose.msra.mxu0 %v762_v35 }
 0x211   : > { %v695_v37 = vpack.c.bf16 %v688_v36, %v688_v36  ;;  %1402 = vmatprep.subr.bf16.mxu0 %v1802_v0 }
 0x212   : > { %v691_v38 = vpop.permute.xlu1 %690 }
 0x213   : > { %v808_v39 = vsel %vm711_vm2, %v695_v37, 0  ;;  %v696_v40 = vpack.c.bf16 %v691_v38, %v691_v38 }
 0x214   : > { %1397 = vmatpush3.bf16.xpose.msra.mxu1 %v808_v39  ;;  %v674_v43 = vpop.permute.xlu0 %673 }
 0x215   : > { %1408 = vmatprep.subr.bf16.mxu1 %v1802_v0  ;;  %v854_v44 = vsel %vm711_vm2, %v696_v40, 0  ;;  %v681_v45 = vpack.c.bf16 %v674_v43, %v674_v43 }
 0x216   : > { %v677_v47 = vpop.permute.xlu1 %676 }
 0x217   : > { %1393 = vmatmul.mubr.msk.bf16.vlgmr.msra.gmra.mrb[8].mxu0 %vm711_vm2, %v680_v41  ;;  %v682_v48 = vpack.c.bf16 %v677_v47, %v677_v47 }
 0x218   : > { %1403 = vmatpush3.bf16.xpose.msra.mxu0 %v854_v44  ;;  %1404 = vmatprep.mubr.msk.bf16.mxu0 %vm1803_vm0, %v1802_v0 }
 0x219   : > { %1414 = vmatprep.subr.bf16.mxu0 %v1802_v0 }
 0x21a   : > { %v699_v56 = vpop.permute.xlu1 %698 }
 0x21b   : > { %1399 = vmatmul.mubr.msk.bf16.vlgmr.msra.gmra.mrb[8].mxu1 %vm711_vm2, %v681_v45  ;;  %v708_v57 = vpack.c.bf16 %v699_v56, %v699_v56 }
 0x21c   : > { %1409 = vmatpush3.bf16.msra.mxu1 %v937_v46  ;;  %1410 = vmatprep.mubr.msk.bf16.mxu1 %vm1803_vm0, %v1802_v0 }
 0x21d   : > { %1420 = vmatprep.subr.bf16.mxu1 %v1802_v0  ;;  %v983_v58 = vsel %vm935_vm3, %v708_v57, 0 }
 0x21f   : > { %1405 = vmatmul.mubr.msk.bf16.vlgmr.msra.gmra.mrb[12].mxu0 %vm711_vm2, %v682_v48 }
 0x220   : > { %1416 = vmatprep.mubr.msk.bf16.mxu0 %vm1803_vm0, %v1802_v0  ;;  %1415 = vmatpush3.bf16.msra.mxu0 %v983_v58 }
 0x221   : > { %1426 = vmatprep.subr.bf16.mxu0 %v1802_v0 }
 0x277   : > { %v752_v49 = vpop.f32.mrb[4].mxu1 }
 0x278   : > { %v896_v50 = vmul.f32 1.442695, %v752_v49  ;;  %v1388_v51 = vpop.f32.mrb[5].mxu1 }
 0x279   : > { %v755_v52 = vpop.f32.mrb[6].mxu1 }
 0x27a   : > { %1541 = vpow2.f32 %v896_v50  ;;  %v1389_v53 = vpop.f32.mrb[7].mxu1 }
 0x284   : > { %v1542_v54 = vpop.eup %1541 }
 0x285   : > { %v904_v55 = vsel %vm711_vm2, %v1542_v54, 0.0 }
 0x286   : > { %905 = vadd.xlane.f32.xlu0 %v904_v55 }
 0x2ea   : > { %v798_v59 = vpop.f32.mrb[8].mxu0 }
 0x2eb   : > { %v898_v60 = vmul.f32 1.442695, %v798_v59  ;;  %v1394_v61 = vpop.f32.mrb[9].mxu0 }
 0x2ec   : > { %v801_v62 = vpop.f32.mrb[10].mxu0 }
 0x2ed   : > { %1543 = vpow2.f32 %v898_v60  ;;  %v1395_v63 = vpop.f32.mrb[11].mxu0 }
 0x2ee   : > { %v844_v1 = vpop.f32.mrb[8].mxu1 }
 0x2ef   : > { %v900_v2 = vmul.f32 1.442695, %v844_v1  ;;  %v1400_v3 = vpop.f32.mrb[9].mxu1 }
 0x2f0   : > { %v847_v4 = vpop.f32.mrb[10].mxu1 }
 0x2f1   : > { %1545 = vpow2.f32 %v900_v2  ;;  %v1401_v5 = vpop.f32.mrb[11].mxu1 }
 0x2f2   : > { %v890_v6 = vpop.f32.mrb[12].mxu0 }
 0x2f3   : > { %v902_v7 = vmul.f32 1.442695, %v890_v6  ;;  %v1406_v8 = vpop.f32.mrb[13].mxu0 }
 0x2f4   : > { %v893_v9 = vpop.f32.mrb[14].mxu0 }
 0x2f5   : > { %1547 = vpow2.f32 %v902_v7  ;;  %v1407_v10 = vpop.f32.mrb[15].mxu0 }
 0x2f7   : > { %v1544_v11 = vpop.eup %1543 }
 0x2f8   : > { %v907_v12 = vsel %vm711_vm2, %v1544_v11, 0.0 }
 0x2f9   : > { %908 = vadd.xlane.f32.xlu1 %v907_v12 }
 0x2fb   : > { %v1546_v13 = vpop.eup %1545 }
 0x2fc   : > { %v910_v14 = vsel %vm711_vm2, %v1546_v13, 0.0 }
 0x2fd   : > { %911 = vadd.xlane.f32.xlu0 %v910_v14 }
 0x2ff   : > { %v1548_v15 = vpop.eup %1547 }
 0x300   : > { %v913_v16 = vsel %vm711_vm2, %v1548_v15, 0.0 }
 0x301   : > { %914 = vadd.xlane.f32.xlu0 %v913_v16 }
 0x30a   : > { %704 = vrot.lane.b32.xlu1 %v2175_v28, %s1806_s23 }
 0x313   : > { %v906_v17 = vpop.xlane.xlu0 %905 }
 0x314   : > { %v916_v18 = vadd.f32 1e-08, %v906_v17 }
 0x316   : > { %1549 = vrcp.f32 %v916_v18 }
 0x317   : > { %701 = vrot.lane.b32.xlu0 %v2175_v28, %s1805_s21 }
 0x320   : > { %v1550_v19 = vpop.eup %1549 }
 0x321   : > { %v924_v20 = vmul.f32 %v1550_v19, %v1542_v54 }
 0x323   : > { %v928_v21 = vpack.c.bf16 %v924_v20, %v924_v20 }
 0x325   : > { %1411 = vmatmul.mubr.msk.bf16.vlgmr.msra.gmra.mrb[12].mxu1 %vm711_vm2, %v928_v21 }
 0x326   : > { %1422 = vmatprep.mubr.msk.bf16.mxu1 %vm1803_vm0, %v1802_v0 }
 0x386   : > { %v909_v22 = vpop.xlane.xlu1 %908 }
 0x387   : > { %v917_v23 = vadd.f32 1e-08, %v909_v22 }
 0x389   : > { %1551 = vrcp.f32 %v917_v23 }
 0x38a   : > { %v912_v24 = vpop.xlane.xlu0 %911  ;;  %v705_v29 = vpop.permute.xlu1 %704 }
 0x38b   : > { %v918_v25 = vadd.f32 1e-08, %v912_v24  ;;  %v710_v33 = vpack.c.bf16 %v705_v29, %v705_v29 }
 0x38d   : > { %1553 = vrcp.f32 %v918_v25  ;;  %v1075_v38 = vsel %vm935_vm3, %v710_v33, 0 }
 0x38e   : > { %v915_v26 = vpop.xlane.xlu0 %914 }
 0x38f   : > { %v919_v27 = vadd.f32 1e-08, %v915_v26 }
 0x391   : > { %1555 = vrcp.f32 %v919_v27 }
 0x392   : > { %v702_v30 = vpop.permute.xlu0 %701 }
 0x393   : > { %v1552_v28 = vpop.eup %1551  ;;  %v709_v31 = vpack.c.bf16 %v702_v30, %v702_v30 }
 0x394   : > { %v925_v32 = vmul.f32 %v1552_v28, %v1544_v11 }
 0x395   : > { %v1029_v34 = vsel %vm935_vm3, %v709_v31, 0 }
 0x396   : > { %1421 = vmatpush3.bf16.msra.mxu1 %v1029_v34  ;;  %v929_v35 = vpack.c.bf16 %v925_v32, %v925_v32 }
 0x397   : > { %v1554_v36 = vpop.eup %1553 }
 0x398   : > { %v926_v37 = vmul.f32 %v1554_v36, %v1546_v13  ;;  %1417 = vmatmul.mubr.msk.bf16.vlgmr.msra.gmra.mrb[16].mxu0 %vm711_vm2, %v929_v35 }
 0x399   : > { %1427 = vmatpush3.bf16.msra.mxu0 %v1075_v38  ;;  %1428 = vmatprep.mubr.msk.bf16.mxu0 %vm1803_vm0, %v1802_v0 }
 0x39a   : > { %v930_v39 = vpack.c.bf16 %v926_v37, %v926_v37 }
 0x39b   : > { %v1556_v40 = vpop.eup %1555 }
 0x39c   : > { %v927_v41 = vmul.f32 %v1556_v40, %v1548_v15  ;;  %1423 = vmatmul.mubr.msk.bf16.vlgmr.msra.gmra.mrb[16].mxu1 %vm711_vm2, %v930_v39 }
 0x39e   : > { %v931_v42 = vpack.c.bf16 %v927_v41, %v927_v41 }
 0x3a0   : > { %1429 = vmatmul.mubr.msk.bf16.vlgmr.msra.gmra.mrb[20].mxu0 %vm711_vm2, %v931_v42 }
 0x3f8   : > { %v973_v43 = vpop.f32.mrb[12].mxu1 }
 0x3f9   : > { %v1412_v44 = vpop.f32.mrb[13].mxu1 }
 0x3fa   : > { %v976_v45 = vpop.f32.mrb[14].mxu1 }
 0x3fb   : > { %v1413_v46 = vpop.f32.mrb[15].mxu1 }
 0x46b   : > { %v1019_v47 = vpop.f32.mrb[16].mxu0 }
 0x46c   : > { %1118 = vrot.lane.b32.xlu1 %v1019_v47, %s1807_s13  ;;  %v1418_v48 = vpop.f32.mrb[17].mxu0 }
 0x46d   : > { %v1022_v49 = vpop.f32.mrb[18].mxu0 }
 0x46e   : > { %v1419_v50 = vpop.f32.mrb[19].mxu0 }
 0x46f   : > { %v1065_v0 = vpop.f32.mrb[16].mxu1 }
 0x470   : > { %1122 = vrot.lane.b32.xlu0 %v1065_v0, %s1808_s7  ;;  %v1424_v51 = vpop.f32.mrb[17].mxu1 }
 0x471   : > { %v1068_v52 = vpop.f32.mrb[18].mxu1 }
 0x472   : > { %v1425_v53 = vpop.f32.mrb[19].mxu1 }
 0x473   : > { %v1111_v54 = vpop.f32.mrb[20].mxu0 }
 0x474   : > { %1126 = vrot.lane.b32.xlu1 %v1111_v54, %s1809_s30  ;;  %v1430_v55 = vpop.f32.mrb[21].mxu0 }
 0x475   : > { %v1114_v56 = vpop.f32.mrb[22].mxu0 }
 0x476   : > { %v1431_v57 = vpop.f32.mrb[23].mxu0 }
 0x4de   : > { %v1119_v58 = vpop.permute.xlu1 %1118 }
 0x4df   : > { %v1129_v60 = vsel %vm711_vm2, %v973_v43, %v1119_v58 }
 0x4e2   : > { %v1123_v59 = vpop.permute.xlu0 %1122 }
 0x4e3   : > { %v1131_v61 = vsel %vm1130_vm4, %v1129_v60, %v1123_v59 }
 0x4e6   : > { %v1127_v62 = vpop.permute.xlu1 %1126 }
 0x4e7   : > { %v1133_v63 = vsel %vm1132_vm5, %v1131_v61, %v1127_v62 }
 0x4e8   : > { %1134 = vst.msk [vmem:[%s464_s24] sm:$0xff] %vm492_vm1, %v1133_v63 }
 0x4e9   : > { %1716 = shalt.err (!%p1713_p8)
}
 0x4ea   : > { %s1717_s3 = scalar_lea.hbm %s2223_s16, 128  ;;  %s1721_s23 = scalar_lea.hbm %s2338_s15, 256 }
 0x4eb   : > { %p1718_p0 = scmp.ne.s32.totalorder %s2223_s16, %s1717_s3  ;;  %p1722_p7 = scmp.lt.u32.totalorder %s2223_s16, %s2338_s15 }
 0x4ec   : > { %p1723_p13 = scmp.lt.u32.totalorder %s1721_s23, %s1717_s3  ;;  %p1725_p2 = scmp.lt.u32.totalorder %s1717_s3, %s2223_s16 }
 0x4ed   : > { %p1719_p5 = pnand %p1718_p0, %p2339_p4 }
 0x4ee   : > { %p1724_p9 = por %p1723_p13, %p1722_p7 }
 0x4ef   : > { %p1720_p12 = pneg %p1719_p5 }
 0x4f0   : > { %p1726_p1 = por %p1725_p2, %p1724_p9 }
 0x4f2   : > { %p1727_p3 = pnand %p1726_p1, %p1720_p12 }
 0x4f4   : > { %1730 = shalt.err (!%p1727_p3)
}
 0x4f5   : > { %1446 = dma.vmem_to_hbm [thread:$0]  (%p2339_p4), %s2225_s9, 128, %s2223_s16, %s1136_s12  }
 0x4f6 PF: > { %s2340_s13 = sld [smem:[#allocation16_spill]]  ;;  %s2341_s7 = sld [smem:[#allocation19_spill]] }
 0x4f7   : > { %s2342_s30 = sld [smem:[#allocation18_spill]] }
 0x4fc   : > { %s1162_s18 = sand.u32 1, %s2340_s13   ;;  %p2343_p11 = scmp.ne.s32.totalorder %s2341_s7, 0 }
 0x4fd   : > { %p2344_p10 = scmp.ge.s32.totalorder %s2342_s30, 2  ;;  %s1163_s19 = scalar_lea.sflag [#allocation4], %s1162_s18 }
 0x4ff   : > { %p1466_p6 = pnand %p2344_p10, %p2343_p11 }
 0x501   : > { %1768 = dma.done.wait (!%p1466_p6), %s1163_s19, 128  }
 0x502   : > { %1770 = vsyncadd (!%p1466_p6), %s1163_s19, 4294967168  ;;  %s29_s14 = sadd.s32 1, %s2342_s30   ;;  %s2345_s29 = sld [smem:[#allocation21_spill]] }
 0x503   : > { %p26_p8 = scmp.ge.s32.totalorder %s29_s14, 4   ;;  %s2346_s12 = sld [smem:[#allocation17_spill]] }
 0x504   : > { %s2347_s13 = sld [smem:[#allocation20_spill]]  ;;  %s2348_s30 = smov %s1777_s10 }
 0x505   : > { %s2349_s10 = smov %s1781_s11  ;;  %28 = sbr.rel (!%p26_p8) target bundleno = 14 (0xe), region = 133 }
 0x508   : > { %s2350_s11 = smov %s2345_s29 }
 0x50c   :  { %1168 = vsyncpa [#allocation3], 1 }
 0x50d   :  { %1170 = vsyncpa [#allocation3 + $0x1], 1 }
 0x50e   :  { %1171 = vsyncpa [#allocation6], 1 }
 0x50f   :  { %1173 = vsyncpa [#allocation6 + $0x1], 1 }
 0x510   :  { %1174 = vsyncpa [#allocation9], 1 }
 0x511   :  { %1175 = vsyncpa [#allocation4], 1 }
 0x512   :  { %1177 = vsyncpa [#allocation4 + $0x1], 1 }

</bundles_post_ra>
